<compile_context>
chip_gen: v6e
topology: v6e:2x2x1
jax: 0.10.0
libtpu: 0.0.40
codegen_flags: <defaults>
</compile_context>

<pallas_src>
import jax
import jax.numpy as jnp
import numpy as np
from jax.experimental import pallas as pl
from jax.experimental.pallas import tpu as pltpu


def _lead_combiner_kernel(x1_ref, x2_ref, w_ref, b_ref, o_ref, lhs_ref):
    # x1_ref : (tb, C*L, T)   view of x as 'b (c l) t'         (compute dtype)
    # x2_ref : (tb, C,  L*T)  view of x as 'b c (l t)'         (compute dtype)
    # w_ref  : (2*C*L, NP)    fused, BN-scaled block-column weight
    # b_ref  : (1, NP)        packed BN shifts (f32)
    # o_ref  : (tb, NP)       lane-dense pooled output slab (f32)
    # lhs_ref: (tb*T, 2*C*L)  VMEM scratch holding the fused K-dim LHS
    tb, cl, t = x1_ref.shape
    rows = tb * t

    # Fused LHS, built once per grid step:
    #   lanes [0, cl)     branch-1 rows (b, t): one batched XLU transpose of the
    #                     whole block (done in f32 for robust lowering, cast back
    #                     to the compute dtype on store)
    #   lanes [cl, 2*cl)  branch-2 rows (b, c): free leading-dim reshape
    lhs1 = jnp.transpose(x1_ref[...].astype(jnp.float32), (0, 2, 1))  # (tb, T, C*L)
    lhs_ref[:, 0:cl] = lhs1.reshape(rows, cl).astype(lhs_ref.dtype)
    lhs_ref[:, cl:2 * cl] = x2_ref[...].reshape(rows, cl)

    # Single lane-dense K = 2*C*L matmul covers both conv1d(k=1)+BN branches
    # (BN scale pre-folded into w_ref in the wrapper); f32 MXU accumulation.
    y = jnp.dot(lhs_ref[...], w_ref[...], preferred_element_type=jnp.float32)

    # AdaptiveMaxPool1d(1) FIRST (per-lane max over the T rows of each batch
    # element: t for branch 1, c for branch 2 -- T == C), THEN BN shift +
    # leaky_relu.  Both post-pool ops are monotone / per-lane constants, so the
    # reorder is exact in eval mode and cuts the VPU epilogue by a factor of T.
    pooled = jnp.max(y.reshape(tb, t, y.shape[-1]), axis=1)          # (tb, NP)
    z = pooled + b_ref[...]
    o_ref[...] = jnp.where(z > 0.0, z, 0.01 * z)                     # leaky_relu(0.01)
    # TODO(synk): dropout(p=0.5) is identity in eval mode; a training-mode path
    # (RNG masking between activation and pool) is not implemented here and
    # would also require the original act-then-pool ordering.


def _pick_batch_tile(B, tb_req):
    """Sublane-aligned batch tile; keep >= 2 grid steps (v7x megacore) when B allows."""
    Bp = -(-B // 8) * 8                      # sublane-align the batch axis
    tb = max(1, min(int(tb_req), Bp))
    if Bp >= 16 and Bp // tb < 2:            # don't collapse to a single grid step
        tb = Bp // 2
    tb = max(8, (tb // 8) * 8)               # keep (tb, NP) output blocks tile-aligned
    Bp = -(-Bp // tb) * tb
    return tb, Bp


def _padded_vmem_bytes(shape, dtype):
    """VMEM footprint of one buffer: minor dim padded to 128 lanes,
    second-minor to the dtype's sublane tile (8 for f32, 16 for bf16)."""
    ebytes = int(np.dtype(dtype).itemsize)
    sub = 8 * (4 // ebytes) if ebytes < 4 else 8
    s = list(shape)
    s[-1] = -(-s[-1] // 128) * 128
    s[-2] = -(-s[-2] // sub) * sub
    return int(np.prod(s)) * ebytes


def lead_combiner_forward(x, params, *, eps=1e-5, tb=128,
                          compute_dtype=jnp.bfloat16):
    """x: [B, out_ch, lead, T] float32 (PyTorch 'b c l t'). Returns [B, 2*out_ch].

    tb = batch elements per grid step (tb*T rows per MXU push).  The default
    tb=128 gives 2048-row tiles; per-step VMEM (double-buffered inputs + fused
    LHS scratch + grid-constant weights) stays well under the 32 MiB scoped
    default even on v7x.  compute_dtype=bf16 halves HBM bytes / doubles the MXU
    rate on v6e/v7x (accumulation and epilogue stay f32).
    """
    B, C, L, T = x.shape
    OC, CIN = params["w1"].shape
    assert CIN == C * L, "conv weight in_channels must equal lead*out_ch"
    assert T == C, "module requires T == out_ch (branch-2 channel count)"

    CL = C * L
    K = 2 * CL                               # fused contraction depth (both branches)
    NP = ((2 * OC + 127) // 128) * 128       # output lanes padded to full vregs

    # ---- fold BatchNorm (eval, running stats) into the conv weights + shifts ----
    s1 = params["gamma1"] * jax.lax.rsqrt(params["var1"] + eps)
    s2 = params["gamma2"] * jax.lax.rsqrt(params["var2"] + eps)
    sh1 = params["beta1"] - params["mean1"] * s1
    sh2 = params["beta2"] - params["mean2"] * s2

    w1s = (params["w1"] * s1[:, None]).T                         # (CL, OC), rows ordered (c, l)
    # permute conv2 columns (t l) -> (l t) so branch 2 consumes the free
    # x.reshape(B, C, L*T) view with no activation transpose at all
    w2_lt = params["w2"].reshape(OC, T, L).transpose(0, 2, 1).reshape(OC, L * T)
    w2s = (w2_lt * s2[:, None]).T                                # (L*T, OC), rows ordered (l, t)

    # single vertically-stacked (K, NP) block-column weight:
    #   rows [0, CL)  -> lanes [0, OC)       (branch 1)
    #   rows [CL, K)  -> lanes [OC, 2*OC)    (branch 2)
    w_blk = (jnp.zeros((K, NP), jnp.float32)
             .at[0:CL, 0:OC].set(w1s)
             .at[CL:K, OC:2 * OC].set(w2s)).astype(compute_dtype)
    bias = (jnp.zeros((1, NP), jnp.float32)
            .at[0, 0:OC].set(sh1)
            .at[0, OC:2 * OC].set(sh2))

    # ---- batch tiling ----
    tb, Bp = _pick_batch_tile(B, tb)
    xc = x.astype(compute_dtype)
    if Bp != B:
        xc = jnp.pad(xc, ((0, Bp - B), (0, 0), (0, 0), (0, 0)))
    x1v = xc.reshape(Bp, CL, T)      # free view: 'b (c l) t'
    x2v = xc.reshape(Bp, C, L * T)   # free view: 'b c (l t)'

    # ---- explicit VMEM budget (double-buffered blocks + scratch + constants) ----
    vmem_budget = (
        2 * (_padded_vmem_bytes((tb, CL, T), compute_dtype)        # x1 blocks
             + _padded_vmem_bytes((tb, C, L * T), compute_dtype)   # x2 blocks
             + _padded_vmem_bytes((tb, NP), jnp.float32)           # out blocks
             + _padded_vmem_bytes((K, NP), compute_dtype)          # weights
             + _padded_vmem_bytes((1, NP), jnp.float32))           # bias
        + _padded_vmem_bytes((tb * T, K), compute_dtype))          # fused-LHS scratch
    ckw = {}
    if vmem_budget > (28 << 20):
        # Only needed when tb is pushed into the high hundreds; on v7x (64 MiB
        # physical VMEM) prefer lowering tb instead of raising this further.
        ckw["vmem_limit_bytes"] = min(int(vmem_budget * 5 // 4), 96 << 20)

    out = pl.pallas_call(
        _lead_combiner_kernel,
        out_shape=jax.ShapeDtypeStruct((Bp, NP), jnp.float32),
        grid=(Bp // tb,),
        in_specs=[
            pl.BlockSpec((tb, CL, T), lambda i: (i, 0, 0)),
            pl.BlockSpec((tb, C, L * T), lambda i: (i, 0, 0)),
            # grid-constant blocks (index_map -> 0); pl.Buffered(1) could drop
            # their redundant second buffer on v7x, kept default-buffered here.
            pl.BlockSpec((K, NP), lambda i: (0, 0)),
            pl.BlockSpec((1, NP), lambda i: (0, 0)),
        ],
        out_specs=pl.BlockSpec((tb, NP), lambda i: (i, 0)),
        scratch_shapes=[pltpu.VMEM((tb * T, K), compute_dtype)],
        compiler_params=pltpu.CompilerParams(
            dimension_semantics=("parallel",), **ckw),
    )(x1v, x2v, w_blk, bias)
    return out[:B, :2 * OC]


def reference_forward(x, params, eps=1e-5):
    """Pure-JAX reference mirroring the PyTorch eval-mode forward."""
    B, C, L, T = x.shape
    x1 = x.reshape(B, C * L, T)                                     # b (c l) t
    y1 = jnp.einsum("oi,bit->bot", params["w1"], x1)
    y1 = (y1 - params["mean1"][None, :, None]) / jnp.sqrt(params["var1"] + eps)[None, :, None]
    y1 = y1 * params["gamma1"][None, :, None] + params["beta1"][None, :, None]
    y1 = jnp.where(y1 > 0, y1, 0.01 * y1)
    p1 = jnp.max(y1, axis=2)

    x2 = jnp.transpose(x, (0, 3, 2, 1)).reshape(B, T * L, C)        # b (t l) c
    y2 = jnp.einsum("oi,bic->boc", params["w2"], x2)
    y2 = (y2 - params["mean2"][None, :, None]) / jnp.sqrt(params["var2"] + eps)[None, :, None]
    y2 = y2 * params["gamma2"][None, :, None] + params["beta2"][None, :, None]
    y2 = jnp.where(y2 > 0, y2, 0.01 * y2)
    p2 = jnp.max(y2, axis=2)
    return jnp.concatenate([p1, p2], axis=1)


def init_params(key, lead, out_ch):
    ks = jax.random.split(key, 10)
    cin = lead * out_ch
    return {
        "w1": jax.random.normal(ks[0], (out_ch, cin), jnp.float32) * (1.0 / np.sqrt(cin)),
        "w2": jax.random.normal(ks[1], (out_ch, cin), jnp.float32) * (1.0 / np.sqrt(cin)),
        "gamma1": 1.0 + 0.1 * jax.random.normal(ks[2], (out_ch,), jnp.float32),
        "beta1": 0.1 * jax.random.normal(ks[3], (out_ch,), jnp.float32),
        "mean1": 0.1 * jax.random.normal(ks[4], (out_ch,), jnp.float32),
        "var1": 0.5 + jnp.abs(jax.random.normal(ks[5], (out_ch,), jnp.float32)),
        "gamma2": 1.0 + 0.1 * jax.random.normal(ks[6], (out_ch,), jnp.float32),
        "beta2": 0.1 * jax.random.normal(ks[7], (out_ch,), jnp.float32),
        "mean2": 0.1 * jax.random.normal(ks[8], (out_ch,), jnp.float32),
        "var2": 0.5 + jnp.abs(jax.random.normal(ks[9], (out_ch,), jnp.float32)),
    }


if __name__ == "__main__":
    # Small, module-consistent shapes: lead=4, out_ch=16 -> in_channels = 64,
    # and the module's branch-2 conv requires T == out_ch.
    B, lead, out_ch = 4, 4, 16
    T = out_ch
    key = jax.random.PRNGKey(0)
    kx, kp = jax.random.split(key)
    x = jax.random.normal(kx, (B, out_ch, lead, T), jnp.float32)
    params = init_params(kp, lead, out_ch)

    ref = jax.block_until_ready(reference_forward(x, params))

    # f32 compute path: bit-tight check of the fused-kernel algebra.
    out_f32 = jax.block_until_ready(
        lead_combiner_forward(x, params, compute_dtype=jnp.float32))
    assert out_f32.shape == (B, 2 * out_ch)
    np.testing.assert_allclose(np.asarray(out_f32), np.asarray(ref),
                               rtol=5e-4, atol=5e-4)

    # Default bf16 DMA/MXU path (f32 accumulate + f32 epilogue); looser tolerance
    # only because inputs/weights are rounded to bf16.
    out_bf16 = jax.block_until_ready(lead_combiner_forward(x, params))
    assert out_bf16.shape == (B, 2 * out_ch)
    np.testing.assert_allclose(np.asarray(out_bf16), np.asarray(ref),
                               rtol=5e-2, atol=5e-2)

    print("KERNEL_OK")
</pallas_src>

<mosaic_0001>
module attributes {stable_mosaic.version = 11 : i64} {
  func.func @_lead_combiner_kernel(%arg0: i32, %arg1: memref<8x64x16xf32, #tpu.memory_space<vmem>>, %arg2: memref<8x16x64xf32, #tpu.memory_space<vmem>>, %arg3: memref<128x128xf32, #tpu.memory_space<vmem>>, %arg4: memref<1x128xf32, #tpu.memory_space<vmem>>, %arg5: memref<8x128xf32, #tpu.memory_space<vmem>>, %arg6: memref<128x128xf32, #tpu.memory_space<vmem>>) attributes {dimension_semantics = [#tpu.dimension_semantics<parallel>], iteration_bounds = array<i64: 1>, scalar_prefetch = 0 : i64, scratch_operands = 1 : i64, tpu.core_type = #tpu.core_type<tc>, window_params = [{transform_indices = @transform_0, window_bounds = array<i64: 8, 64, 16>}, {transform_indices = @transform_1, window_bounds = array<i64: 8, 16, 64>}, {pipeline_mode = #tpu.pipeline_mode<synchronous>, transform_indices = @transform_2, window_bounds = array<i64: 128, 128>}, {pipeline_mode = #tpu.pipeline_mode<synchronous>, transform_indices = @transform_3, window_bounds = array<i64: 1, 128>}, {transform_indices = @transform_4, window_bounds = array<i64: 8, 128>}]} {
    %c0 = arith.constant 0 : index
    %c0_0 = arith.constant 0 : index
    %c0_1 = arith.constant 0 : index
    %0 = vector.load %arg1[%c0, %c0_0, %c0_1] : memref<8x64x16xf32, #tpu.memory_space<vmem>>, vector<8x64x16xf32>
    %1 = tpu.transpose %0, [0, 2, 1] : vector<8x64x16xf32> -> vector<8x16x64xf32>
    %2 = vector.shape_cast %1 : vector<8x16x64xf32> to vector<128x64xf32>
    %c0_2 = arith.constant 0 : index
    %c0_3 = arith.constant 0 : index
    %3 = vector.load %arg6[%c0_2, %c0_3] : memref<128x128xf32, #tpu.memory_space<vmem>>, vector<128x64xf32>
    tpu.vector_store %arg6[%c0_2, %c0_3], %2 {strides = array<i32>} : memref<128x128xf32, #tpu.memory_space<vmem>>, vector<128x64xf32>,
    %c0_4 = arith.constant 0 : index
    %c0_5 = arith.constant 0 : index
    %c0_6 = arith.constant 0 : index
    %4 = vector.load %arg2[%c0_4, %c0_5, %c0_6] : memref<8x16x64xf32, #tpu.memory_space<vmem>>, vector<8x16x64xf32>
    %5 = vector.shape_cast %4 : vector<8x16x64xf32> to vector<128x64xf32>
    %c0_7 = arith.constant 0 : index
    %c64 = arith.constant 64 : index
    %6 = vector.load %arg6[%c0_7, %c64] : memref<128x128xf32, #tpu.memory_space<vmem>>, vector<128x64xf32>
    tpu.vector_store %arg6[%c0_7, %c64], %5 {strides = array<i32>} : memref<128x128xf32, #tpu.memory_space<vmem>>, vector<128x64xf32>,
    %c0_8 = arith.constant 0 : index
    %c0_9 = arith.constant 0 : index
    %7 = vector.load %arg6[%c0_8, %c0_9] : memref<128x128xf32, #tpu.memory_space<vmem>>, vector<128x128xf32>
    %c0_10 = arith.constant 0 : index
    %c0_11 = arith.constant 0 : index
    %8 = vector.load %arg3[%c0_10, %c0_11] : memref<128x128xf32, #tpu.memory_space<vmem>>, vector<128x128xf32>
    %cst = arith.constant dense<0.000000e+00> : vector<128x128xf32>
    %9 = tpu.matmul %7, %8, %cst {dimension_numbers = #tpu.dot_dimension_numbers<[1], [0], [0], [1], [0, 0, 1, 1], [], []>} : vector<128x128xf32>, vector<128x128xf32>, vector<128x128xf32> -> vector<128x128xf32>
    %10 = vector.shape_cast %9 : vector<128x128xf32> to vector<8x16x128xf32>
    %cst_12 = arith.constant dense<0xFF800000> : vector<8x128xf32>
    %11 = vector.multi_reduction <maximumf>, %10, %cst_12 [1] : vector<8x16x128xf32> to vector<8x128xf32>
    %c0_13 = arith.constant 0 : index
    %c0_14 = arith.constant 0 : index
    %12 = vector.load %arg4[%c0_13, %c0_14] : memref<1x128xf32, #tpu.memory_space<vmem>>, vector<1x128xf32>
    %13 = vector.broadcast %12 : vector<1x128xf32> to vector<8x128xf32>
    %14 = arith.addf %11, %13 : vector<8x128xf32>
    %cst_15 = arith.constant 0.000000e+00 : f32
    %15 = vector.broadcast %cst_15 : f32 to vector<8x128xf32>
    %16 = arith.cmpf ogt, %14, %15 : vector<8x128xf32>
    %cst_16 = arith.constant 0.00999999977 : f32
    %17 = vector.broadcast %cst_16 : f32 to vector<8x128xf32>
    %18 = arith.mulf %17, %14 : vector<8x128xf32>
    %19 = arith.select %16, %14, %18 : vector<8x128xi1>, vector<8x128xf32>
    %c0_17 = arith.constant 0 : index
    %c0_18 = arith.constant 0 : index
    %20 = vector.load %arg5[%c0_17, %c0_18] : memref<8x128xf32, #tpu.memory_space<vmem>>, vector<8x128xf32>
    tpu.vector_store %arg5[%c0_17, %c0_18], %19 {strides = array<i32>} : memref<8x128xf32, #tpu.memory_space<vmem>>, vector<8x128xf32>,
    return
  }
  func.func @transform_0(%arg0: i32) -> (i32, i32, i32) {
    %c0_i32 = arith.constant 0 : i32
    %c0_i32_0 = arith.constant 0 : i32
    %c0_i32_1 = arith.constant 0 : i32
    return %arg0, %c0_i32, %c0_i32_0 : i32, i32, i32
  }
  func.func @transform_1(%arg0: i32) -> (i32, i32, i32) {
    %c0_i32 = arith.constant 0 : i32
    %c0_i32_0 = arith.constant 0 : i32
    %c0_i32_1 = arith.constant 0 : i32
    return %arg0, %c0_i32, %c0_i32_0 : i32, i32, i32
  }
  func.func @transform_2(%arg0: i32) -> (i32, i32) {
    %c0_i32 = arith.constant 0 : i32
    %c0_i32_0 = arith.constant 0 : i32
    %c0_i32_1 = arith.constant 0 : i32
    return %c0_i32, %c0_i32_0 : i32, i32
  }
  func.func @transform_3(%arg0: i32) -> (i32, i32) {
    %c0_i32 = arith.constant 0 : i32
    %c0_i32_0 = arith.constant 0 : i32
    %c0_i32_1 = arith.constant 0 : i32
    return %c0_i32, %c0_i32_0 : i32, i32
  }
  func.func @transform_4(%arg0: i32) -> (i32, i32) {
    %c0_i32 = arith.constant 0 : i32
    %c0_i32_0 = arith.constant 0 : i32
    return %arg0, %c0_i32 : i32, i32
  }
}

</mosaic_0001>

<bundles_post_ra>
// kernel: tpu_custom_call.1
= control target key start
LH: loop header
LB: loop body
LE: loop exit
PB: predicated region body
PF: predicated region fallthrough
CT: control target
= control target key end

     0   :  { %s915_s19 = smov 64   ;;  %s1332_s0 = inlined_call_operand.vmem [shape: f32[8,64,16], index: 0, kind: input, shape index: {}]   ;;  %s1333_s1 = inlined_call_operand.vmem [shape: f32[8,16,64], index: 1, kind: input, shape index: {}]   ;;  %s1334_s2 = inlined_call_operand.vmem [shape: f32[128,128], index: 2, kind: input, shape index: {}]   ;;  %s1335_s3 = inlined_call_operand.vmem [shape: f32[1,128], index: 3, kind: input, shape index: {}]   ;;  %s1336_s4 = inlined_call_operand.hbm [shape: f32[8,128], index: 4, kind: output, shape index: {}]  }
   0x1   :  { %v357_v0 = vld [vmem:[%s1333_s1 + $0x10] sm:$0xff]  ;;  %v355_v1 = vld [vmem:[%s1333_s1] sm:$0xff]  ;;  %v356_v3 = vld [vmem:[%s1333_s1 + $0x8] sm:$0xff] }
   0x2   :  { %391 = vrot.lane.b32.xlu1 %v357_v0, %s915_s19  ;;  %387 = vrot.lane.b32.xlu0 %v355_v1, %s915_s19  ;;  %v363_v2 = vld [vmem:[%s1333_s1 + $0x40] sm:$0xff]  ;;  %v364_v4 = vld [vmem:[%s1333_s1 + $0x48] sm:$0xff] }
   0x3   :  { %v358_v5 = vld [vmem:[%s1333_s1 + $0x18] sm:$0xff]  ;;  %v365_v6 = vld [vmem:[%s1333_s1 + $0x50] sm:$0xff]  ;;  %v359_v7 = vld [vmem:[%s1333_s1 + $0x20] sm:$0xff] }
   0x4   :  { %v366_v8 = vld [vmem:[%s1333_s1 + $0x58] sm:$0xff]  ;;  %v360_v9 = vld [vmem:[%s1333_s1 + $0x28] sm:$0xff]  ;;  %v367_v10 = vld [vmem:[%s1333_s1 + $0x60] sm:$0xff] }
   0x5   :  { %v361_v11 = vld [vmem:[%s1333_s1 + $0x30] sm:$0xff]  ;;  %v368_v12 = vld [vmem:[%s1333_s1 + $0x68] sm:$0xff]  ;;  %v362_v13 = vld [vmem:[%s1333_s1 + $0x38] sm:$0xff] }
   0x6   :  { %403 = vrot.lane.b32.xlu1 %v363_v2, %s915_s19  ;;  %389 = vrot.lane.b32.xlu0 %v356_v3, %s915_s19 }
   0xa   :  { %405 = vrot.lane.b32.xlu1 %v364_v4, %s915_s19  ;;  %393 = vrot.lane.b32.xlu0 %v358_v5, %s915_s19 }
   0xe   :  { %407 = vrot.lane.b32.xlu1 %v365_v6, %s915_s19  ;;  %395 = vrot.lane.b32.xlu0 %v359_v7, %s915_s19 }
  0x12   :  { %409 = vrot.lane.b32.xlu1 %v366_v8, %s915_s19  ;;  %397 = vrot.lane.b32.xlu0 %v360_v9, %s915_s19 }
  0x16   :  { %411 = vrot.lane.b32.xlu1 %v367_v10, %s915_s19  ;;  %399 = vrot.lane.b32.xlu0 %v361_v11, %s915_s19 }
  0x17   :  { %9 = vsyncpa [#allocation4], 0  ;;  %v370_v14 = vld [vmem:[%s1333_s1 + $0x78] sm:$0xff]  ;;  %v369_v15 = vld [vmem:[%s1333_s1 + $0x70] sm:$0xff]  ;;  %vm338_vm0 = vcmask 523264   ;;  %vm435_vm1 = vcmask 1048064  }
  0x18   :  { %v483_v16 = vld [vmem:[%s1334_s2 + $0x78] sm:$0xff]  ;;  %v482_v17 = vld [vmem:[%s1334_s2 + $0x70] sm:$0xff]  ;;  %v481_v18 = vld [vmem:[%s1334_s2 + $0x68] sm:$0xff]  ;;  %vm733_vm7 = vcmask 1041409   ;;  %vm736_vm8 = vcmask 1042434   ;;  %vm739_vm9 = vcmask 1043459  }
  0x19   :  { %802 = vmatprep.subr.mxu0 %v483_v16  ;;  %858 = vmatprep.subr.mxu1 %v483_v16  ;;  %v480_v19 = vld [vmem:[%s1334_s2 + $0x60] sm:$0xff]  ;;  %v479_v20 = vld [vmem:[%s1334_s2 + $0x58] sm:$0xff]  ;;  %v478_v21 = vld [vmem:[%s1334_s2 + $0x50] sm:$0xff]  ;;  %vm742_vm12 = vcmask 1044484   ;;  %vm745_vm13 = vcmask 1045509   ;;  %vm748_vm15 = vcmask 1046534  }
  0x1a   :  { %413 = vrot.lane.b32.xlu1 %v368_v12, %s915_s19  ;;  %401 = vrot.lane.b32.xlu0 %v362_v13, %s915_s19  ;;  %v477_v22 = vld [vmem:[%s1334_s2 + $0x48] sm:$0xff]  ;;  %v476_v23 = vld [vmem:[%s1334_s2 + $0x40] sm:$0xff] }
  0x1b   :  { %803 = vmatpush3.msra.mxu0 %v483_v16  ;;  %874 = vmatpush3.msra.mxu1 %v483_v16  ;;  %v475_v24 = vld [vmem:[%s1334_s2 + $0x38] sm:$0xff]  ;;  %v474_v25 = vld [vmem:[%s1334_s2 + $0x30] sm:$0xff]  ;;  %v18_v26 = vld [vmem:[%s1332_s0] sm:$0xff] }
  0x1c   :  { %804 = vmatprep.subr.mxu0 %v482_v17  ;;  %859 = vmatprep.subr.mxu1 %v482_v17  ;;  %v473_v27 = vld [vmem:[%s1334_s2 + $0x28] sm:$0xff]  ;;  %v472_v28 = vld [vmem:[%s1334_s2 + $0x20] sm:$0xff]  ;;  %v471_v30 = vld [vmem:[%s1334_s2 + $0x18] sm:$0xff] }
  0x1d   :  { %805 = vmatpush3.msra.mxu0 %v482_v17  ;;  %875 = vmatpush3.msra.mxu1 %v482_v17  ;;  %v19_v29 = vld [vmem:[%s1332_s0 + $0x8] sm:$0xff]  ;;  %v470_v31 = vld [vmem:[%s1334_s2 + $0x10] sm:$0xff]  ;;  %v468_v34 = vld [vmem:[%s1334_s2] sm:$0xff] }
  0x1e   :  { %417 = vrot.lane.b32.xlu1 %v370_v14, %s915_s19  ;;  %415 = vrot.lane.b32.xlu0 %v369_v15, %s915_s19  ;;  %v469_v32 = vld [vmem:[%s1334_s2 + $0x8] sm:$0xff]  ;;  %v20_v33 = vld [vmem:[%s1332_s0 + $0x10] sm:$0xff] }
  0x1f   :  { %806 = vmatprep.subr.mxu0 %v481_v18  ;;  %860 = vmatprep.subr.mxu1 %v481_v18  ;;  %v26_v35 = vld [vmem:[%s1332_s0 + $0x40] sm:$0xff]  ;;  %v21_v36 = vld [vmem:[%s1332_s0 + $0x18] sm:$0xff]  ;;  %v27_v37 = vld [vmem:[%s1332_s0 + $0x48] sm:$0xff] }
  0x20   :  { %807 = vmatpush3.msra.mxu0 %v481_v18  ;;  %876 = vmatpush3.msra.mxu1 %v481_v18  ;;  %v22_v38 = vld [vmem:[%s1332_s0 + $0x20] sm:$0xff]  ;;  %v28_v39 = vld [vmem:[%s1332_s0 + $0x50] sm:$0xff]  ;;  %v23_v40 = vld [vmem:[%s1332_s0 + $0x28] sm:$0xff] }
  0x21   :  { %808 = vmatprep.subr.mxu0 %v480_v19  ;;  %861 = vmatprep.subr.mxu1 %v480_v19  ;;  %v29_v41 = vld [vmem:[%s1332_s0 + $0x58] sm:$0xff]  ;;  %v24_v42 = vld [vmem:[%s1332_s0 + $0x30] sm:$0xff]  ;;  %v30_v43 = vld [vmem:[%s1332_s0 + $0x60] sm:$0xff] }
  0x22   :  { %809 = vmatpush3.msra.mxu0 %v480_v19  ;;  %877 = vmatpush3.msra.mxu1 %v480_v19  ;;  %v25_v44 = vld [vmem:[%s1332_s0 + $0x38] sm:$0xff]  ;;  %v31_v45 = vld [vmem:[%s1332_s0 + $0x68] sm:$0xff]  ;;  %v50_v46 = vld [vmem:[%s1332_s0 + $0x100] sm:$0xff] }
  0x23   :  { %810 = vmatprep.subr.mxu0 %v479_v20  ;;  %862 = vmatprep.subr.mxu1 %v479_v20  ;;  %v32_v47 = vld [vmem:[%s1332_s0 + $0x70] sm:$0xff]  ;;  %v51_v48 = vld [vmem:[%s1332_s0 + $0x108] sm:$0xff]  ;;  %v33_v49 = vld [vmem:[%s1332_s0 + $0x78] sm:$0xff] }
  0x24   :  { %811 = vmatpush3.msra.mxu0 %v479_v20  ;;  %878 = vmatpush3.msra.mxu1 %v479_v20  ;;  %v52_v50 = vld [vmem:[%s1332_s0 + $0x110] sm:$0xff]  ;;  %v34_v51 = vld [vmem:[%s1332_s0 + $0x80] sm:$0xff]  ;;  %v53_v52 = vld [vmem:[%s1332_s0 + $0x118] sm:$0xff] }
  0x25   :  { %812 = vmatprep.subr.mxu0 %v478_v21  ;;  %863 = vmatprep.subr.mxu1 %v478_v21  ;;  %v35_v53 = vld [vmem:[%s1332_s0 + $0x88] sm:$0xff]  ;;  %v54_v54 = vld [vmem:[%s1332_s0 + $0x120] sm:$0xff]  ;;  %v36_v55 = vld [vmem:[%s1332_s0 + $0x90] sm:$0xff] }
  0x26   :  { %813 = vmatpush3.msra.mxu0 %v478_v21  ;;  %879 = vmatpush3.msra.mxu1 %v478_v21  ;;  %v55_v56 = vld [vmem:[%s1332_s0 + $0x128] sm:$0xff]  ;;  %v37_v57 = vld [vmem:[%s1332_s0 + $0x98] sm:$0xff]  ;;  %v56_v58 = vld [vmem:[%s1332_s0 + $0x130] sm:$0xff] }
  0x27   :  { %814 = vmatprep.subr.mxu0 %v477_v22  ;;  %864 = vmatprep.subr.mxu1 %v477_v22  ;;  %v38_v59 = vld [vmem:[%s1332_s0 + $0xa0] sm:$0xff]  ;;  %v57_v60 = vld [vmem:[%s1332_s0 + $0x138] sm:$0xff]  ;;  %v39_v61 = vld [vmem:[%s1332_s0 + $0xa8] sm:$0xff] }
  0x28   :  { %815 = vmatpush3.msra.mxu0 %v477_v22  ;;  %880 = vmatpush3.msra.mxu1 %v477_v22  ;;  %v58_v62 = vld [vmem:[%s1332_s0 + $0x140] sm:$0xff]  ;;  %v40_v63 = vld [vmem:[%s1332_s0 + $0xb0] sm:$0xff]  ;;  %v59_v0 = vld [vmem:[%s1332_s0 + $0x148] sm:$0xff] }
  0x29   :  { %816 = vmatprep.subr.mxu0 %v476_v23  ;;  %865 = vmatprep.subr.mxu1 %v476_v23  ;;  %v41_v1 = vld [vmem:[%s1332_s0 + $0xb8] sm:$0xff]  ;;  %v60_v2 = vld [vmem:[%s1332_s0 + $0x150] sm:$0xff]  ;;  %v42_v3 = vld [vmem:[%s1332_s0 + $0xc0] sm:$0xff] }
  0x2a   :  { %817 = vmatpush3.msra.mxu0 %v476_v23  ;;  %881 = vmatpush3.msra.mxu1 %v476_v23  ;;  %v61_v4 = vld [vmem:[%s1332_s0 + $0x158] sm:$0xff]  ;;  %v43_v5 = vld [vmem:[%s1332_s0 + $0xc8] sm:$0xff]  ;;  %v62_v6 = vld [vmem:[%s1332_s0 + $0x160] sm:$0xff] }
  0x2b   :  { %818 = vmatprep.subr.mxu0 %v475_v24  ;;  %866 = vmatprep.subr.mxu1 %v475_v24  ;;  %v44_v8 = vld [vmem:[%s1332_s0 + $0xd0] sm:$0xff]  ;;  %v63_v9 = vld [vmem:[%s1332_s0 + $0x168] sm:$0xff]  ;;  %v45_v11 = vld [vmem:[%s1332_s0 + $0xd8] sm:$0xff] }
  0x2c   :  { %819 = vmatpush3.msra.mxu0 %v475_v24  ;;  %882 = vmatpush3.msra.mxu1 %v475_v24  ;;  %v64_v12 = vld [vmem:[%s1332_s0 + $0x170] sm:$0xff]  ;;  %v46_v13 = vld [vmem:[%s1332_s0 + $0xe0] sm:$0xff]  ;;  %v65_v15 = vld [vmem:[%s1332_s0 + $0x178] sm:$0xff] }
  0x2d   :  { %820 = vmatprep.subr.mxu0 %v474_v25  ;;  %867 = vmatprep.subr.mxu1 %v474_v25  ;;  %v47_v17 = vld [vmem:[%s1332_s0 + $0xe8] sm:$0xff]  ;;  %v66_v18 = vld [vmem:[%s1332_s0 + $0x180] sm:$0xff]  ;;  %v48_v21 = vld [vmem:[%s1332_s0 + $0xf0] sm:$0xff] }
  0x2e   :  { %821 = vmatpush3.msra.mxu0 %v474_v25  ;;  %883 = vmatpush3.msra.mxu1 %v474_v25  ;;  %v67_v22 = vld [vmem:[%s1332_s0 + $0x188] sm:$0xff]  ;;  %v49_v23 = vld [vmem:[%s1332_s0 + $0xf8] sm:$0xff]  ;;  %v68_v25 = vld [vmem:[%s1332_s0 + $0x190] sm:$0xff] }
  0x2f   :  { %822 = vmatprep.subr.mxu0 %v473_v27  ;;  %868 = vmatprep.subr.mxu1 %v473_v27 }
  0x30   :  { %823 = vmatpush3.msra.mxu0 %v473_v27  ;;  %884 = vmatpush3.msra.mxu1 %v473_v27  ;;  %v74_v27 = vld [vmem:[%s1332_s0 + $0x1c0] sm:$0xff] }
  0x31   :  { %824 = vmatprep.subr.mxu0 %v472_v28  ;;  %869 = vmatprep.subr.mxu1 %v472_v28 }
  0x32   :  { %825 = vmatpush3.msra.mxu0 %v472_v28  ;;  %885 = vmatpush3.msra.mxu1 %v472_v28  ;;  %v69_v28 = vld [vmem:[%s1332_s0 + $0x198] sm:$0xff] }
  0x33   :  { %826 = vmatprep.subr.mxu0 %v471_v30  ;;  %870 = vmatprep.subr.mxu1 %v471_v30 }
  0x34   :  { %827 = vmatpush3.msra.mxu0 %v471_v30  ;;  %886 = vmatpush3.msra.mxu1 %v471_v30 }
  0x35   :  { %828 = vmatprep.subr.mxu0 %v470_v31  ;;  %871 = vmatprep.subr.mxu1 %v470_v31 }
  0x36   :  { %829 = vmatpush3.msra.mxu0 %v470_v31  ;;  %887 = vmatpush3.msra.mxu1 %v470_v31  ;;  %v75_v31 = vld [vmem:[%s1332_s0 + $0x1c8] sm:$0xff] }
  0x37   :  { %830 = vmatprep.subr.mxu0 %v469_v32  ;;  %872 = vmatprep.subr.mxu1 %v469_v32 }
  0x38   :  { %831 = vmatpush3.msra.mxu0 %v469_v32  ;;  %888 = vmatpush3.msra.mxu1 %v469_v32  ;;  %v70_v32 = vld [vmem:[%s1332_s0 + $0x1a0] sm:$0xff] }
  0x39   :  { %832 = vmatprep.subr.mxu0 %v468_v34  ;;  %873 = vmatprep.subr.mxu1 %v468_v34 }
  0x3a   :  { %833 = vmatpush3.msra.mxu0 %v468_v34  ;;  %889 = vmatpush3.msra.mxu1 %v468_v34 }
  0x3c   :  { %82 = vxpose.xlu0.b32.start [1/8] (short) (narrow) %v18_v26, 16 }
  0x40   :  { %83 = vxpose.xlu0.b32.cont [2/8] (short) (narrow) %v19_v29, 16 }
  0x44   :  { %84 = vxpose.xlu0.b32.cont [3/8] (short) (narrow) %v20_v33, 16  ;;  %v76_v33 = vld [vmem:[%s1332_s0 + $0x1d0] sm:$0xff] }
  0x47   :  { %114 = vxpose.xlu1.b32.start [1/8] (short) (narrow) %v26_v35, 16  ;;  %v71_v35 = vld [vmem:[%s1332_s0 + $0x1a8] sm:$0xff] }
  0x48   :  { %85 = vxpose.xlu0.b32.cont [4/8] (short) (narrow) %v21_v36, 16 }
  0x4b   :  { %115 = vxpose.xlu1.b32.cont [2/8] (short) (narrow) %v27_v37, 16  ;;  %v77_v37 = vld [vmem:[%s1332_s0 + $0x1d8] sm:$0xff] }
  0x4c   :  { %86 = vxpose.xlu0.b32.cont [5/8] (short) (narrow) %v22_v38, 16  ;;  %v72_v38 = vld [vmem:[%s1332_s0 + $0x1b0] sm:$0xff] }
  0x4f   :  { %116 = vxpose.xlu1.b32.cont [3/8] (short) (narrow) %v28_v39, 16 }
  0x50   :  { %87 = vxpose.xlu0.b32.cont [6/8] (short) (narrow) %v23_v40, 16 }
  0x53   :  { %117 = vxpose.xlu1.b32.cont [4/8] (short) (narrow) %v29_v41, 16  ;;  %v78_v41 = vld [vmem:[%s1332_s0 + $0x1e0] sm:$0xff] }
  0x54   :  { %88 = vxpose.xlu0.b32.cont [7/8] (short) (narrow) %v24_v42, 16  ;;  %v73_v42 = vld [vmem:[%s1332_s0 + $0x1b8] sm:$0xff] }
  0x57   :  { %118 = vxpose.xlu1.b32.cont [5/8] (short) (narrow) %v30_v43, 16 }
  0x58   :  { %89 = vxpose.xlu0.b32.end [8/8] (short) (narrow) %v25_v44, 16  ;;  %v79_v44 = vld [vmem:[%s1332_s0 + $0x1e8] sm:$0xff] }
  0x5b   :  { %119 = vxpose.xlu1.b32.cont [6/8] (short) (narrow) %v31_v45, 16 }
  0x5c   :  { %210 = vxpose.xlu0.b32.start [1/8] (short) (narrow) %v50_v46, 16 }
  0x5f   :  { %120 = vxpose.xlu1.b32.cont [7/8] (short) (narrow) %v32_v47, 16  ;;  %v80_v47 = vld [vmem:[%s1332_s0 + $0x1f0] sm:$0xff] }
  0x60   :  { %211 = vxpose.xlu0.b32.cont [2/8] (short) (narrow) %v51_v48, 16 }
  0x63   :  { %121 = vxpose.xlu1.b32.end [8/8] (short) (narrow) %v33_v49, 16  ;;  %v81_v49 = vld [vmem:[%s1332_s0 + $0x1f8] sm:$0xff] }
  0x64   :  { %212 = vxpose.xlu0.b32.cont [3/8] (short) (narrow) %v52_v50, 16 }
  0x67   :  { %146 = vxpose.xlu1.b32.start [1/8] (short) (narrow) %v34_v51, 16 }
  0x68   :  { %213 = vxpose.xlu0.b32.cont [4/8] (short) (narrow) %v53_v52, 16 }
  0x6b   :  { %147 = vxpose.xlu1.b32.cont [2/8] (short) (narrow) %v35_v53, 16 }
  0x6c   :  { %214 = vxpose.xlu0.b32.cont [5/8] (short) (narrow) %v54_v54, 16 }
  0x6f   :  { %148 = vxpose.xlu1.b32.cont [3/8] (short) (narrow) %v36_v55, 16 }
  0x70   :  { %215 = vxpose.xlu0.b32.cont [6/8] (short) (narrow) %v55_v56, 16 }
  0x73   :  { %149 = vxpose.xlu1.b32.cont [4/8] (short) (narrow) %v37_v57, 16 }
  0x74   :  { %216 = vxpose.xlu0.b32.cont [7/8] (short) (narrow) %v56_v58, 16  ;;  %v1171_v7 = vpop.permute.xlu0 %387  ;;  %v1190_v14 = vpop.permute.xlu1 %391 }
  0x77   :  { %150 = vxpose.xlu1.b32.cont [5/8] (short) (narrow) %v38_v59, 16 }
  0x78   :  { %217 = vxpose.xlu0.b32.end [8/8] (short) (narrow) %v57_v60, 16  ;;  %v1179_v10 = vpop.permute.xlu0 %389  ;;  %v1203_v19 = vpop.permute.xlu1 %403 }
  0x7b   :  { %151 = vxpose.xlu1.b32.cont [6/8] (short) (narrow) %v39_v61, 16 }
  0x7c   :  { %242 = vxpose.xlu0.b32.start [1/8] (short) (narrow) %v58_v62, 16  ;;  %v1195_v16 = vpop.permute.xlu0 %393  ;;  %v1216_v24 = vpop.permute.xlu1 %405 }
  0x7f   :  { %152 = vxpose.xlu1.b32.cont [7/8] (short) (narrow) %v40_v63, 16 }
  0x80   :  { %243 = vxpose.xlu0.b32.cont [2/8] (short) (narrow) %v59_v0, 16  ;;  %v1205_v20 = vpop.permute.xlu0 %395  ;;  %v1229_v29 = vpop.permute.xlu1 %407 }
  0x83   :  { %153 = vxpose.xlu1.b32.end [8/8] (short) (narrow) %v41_v1, 16 }
  0x84   :  { %244 = vxpose.xlu0.b32.cont [3/8] (short) (narrow) %v60_v2, 16  ;;  %v1221_v26 = vpop.permute.xlu0 %397  ;;  %v1242_v34 = vpop.permute.xlu1 %409 }
  0x87   :  { %178 = vxpose.xlu1.b32.start [1/8] (short) (narrow) %v42_v3, 16 }
  0x88   :  { %245 = vxpose.xlu0.b32.cont [4/8] (short) (narrow) %v61_v4, 16  ;;  %v1231_v30 = vpop.permute.xlu0 %399  ;;  %v1255_v39 = vpop.permute.xlu1 %411 }
  0x8b   :  { %179 = vxpose.xlu1.b32.cont [2/8] (short) (narrow) %v43_v5, 16 }
  0x8c   :  { %246 = vxpose.xlu0.b32.cont [5/8] (short) (narrow) %v62_v6, 16  ;;  %v1247_v36 = vpop.permute.xlu0 %401  ;;  %v1268_v45 = vpop.permute.xlu1 %413 }
  0x8f   :  { %180 = vxpose.xlu1.b32.cont [3/8] (short) (narrow) %v44_v8, 16 }
  0x90   :  { %247 = vxpose.xlu0.b32.cont [6/8] (short) (narrow) %v63_v9, 16  ;;  %v1257_v40 = vpop.permute.xlu0 %415  ;;  %v1279_v48 = vpop.permute.xlu1 %417 }
  0x93   :  { %181 = vxpose.xlu1.b32.cont [4/8] (short) (narrow) %v45_v11, 16 }
  0x94   :  { %248 = vxpose.xlu0.b32.cont [7/8] (short) (narrow) %v64_v12, 16 }
  0x97   :  { %182 = vxpose.xlu1.b32.cont [5/8] (short) (narrow) %v46_v13, 16 }
  0x98   :  { %249 = vxpose.xlu0.b32.end [8/8] (short) (narrow) %v65_v15, 16 }
  0x9b   :  { %183 = vxpose.xlu1.b32.cont [6/8] (short) (narrow) %v47_v17, 16 }
  0x9c   :  { %274 = vxpose.xlu0.b32.start [1/8] (short) (narrow) %v66_v18, 16 }
  0x9f   :  { %184 = vxpose.xlu1.b32.cont [7/8] (short) (narrow) %v48_v21, 16 }
  0xa0   :  { %275 = vxpose.xlu0.b32.cont [2/8] (short) (narrow) %v67_v22, 16 }
  0xa3   :  { %185 = vxpose.xlu1.b32.end [8/8] (short) (narrow) %v49_v23, 16 }
  0xa4   :  { %276 = vxpose.xlu0.b32.cont [3/8] (short) (narrow) %v68_v25, 16 }
  0xa7   :  { %306 = vxpose.xlu1.b32.start [1/8] (short) (narrow) %v74_v27, 16 }
  0xa8   :  { %277 = vxpose.xlu0.b32.cont [4/8] (short) (narrow) %v69_v28, 16 }
  0xab   :  { %307 = vxpose.xlu1.b32.cont [2/8] (short) (narrow) %v75_v31, 16 }
  0xac   :  { %278 = vxpose.xlu0.b32.cont [5/8] (short) (narrow) %v70_v32, 16 }
  0xaf   :  { %308 = vxpose.xlu1.b32.cont [3/8] (short) (narrow) %v76_v33, 16 }
  0xb0   :  { %279 = vxpose.xlu0.b32.cont [6/8] (short) (narrow) %v71_v35, 16 }
  0xb3   :  { %309 = vxpose.xlu1.b32.cont [4/8] (short) (narrow) %v77_v37, 16 }
  0xb4   :  { %280 = vxpose.xlu0.b32.cont [7/8] (short) (narrow) %v72_v38, 16 }
  0xb7   :  { %310 = vxpose.xlu1.b32.cont [5/8] (short) (narrow) %v78_v41, 16 }
  0xb8   :  { %281 = vxpose.xlu0.b32.end [8/8] (short) (narrow) %v73_v42, 16  ;;  %v98_v43 = vpop.trf.xlu0 }
  0xb9   :  { %339 = vst.msk [vmem:[#allocation2] sm:$0xff] %vm338_vm0, %v98_v43 }
  0xba   :  { %436 = vst.msk [vmem:[#allocation2] sm:$0xff] %vm435_vm1, %v1171_v7 }
  0xbb   :  { %311 = vxpose.xlu1.b32.cont [6/8] (short) (narrow) %v79_v44, 16 }
  0xbc   :  { %v99_v46 = vpop.trf.xlu0 }
  0xbd   :  { %340 = vst.msk [vmem:[#allocation2 + $0x8] sm:$0xff] %vm338_vm0, %v99_v46 }
  0xbe   :  { %437 = vst.msk [vmem:[#allocation2 + $0x8] sm:$0xff] %vm435_vm1, %v1179_v10 }
  0xbf   :  { %312 = vxpose.xlu1.b32.cont [7/8] (short) (narrow) %v80_v47, 16 }
  0xc1   :  { %v452_v50 = vld [vmem:[#allocation2] sm:$0xff] }
  0xc2   :  { %834 = vmatprep.mubr.f32.mxu0 %v452_v50 }
  0xc3   :  { %313 = vxpose.xlu1.b32.end [8/8] (short) (narrow) %v81_v49, 16  ;;  %v130_v51 = vpop.trf.xlu1 }
  0xc4   :  { %341 = vst.msk [vmem:[#allocation2 + $0x10] sm:$0xff] %vm338_vm0, %v130_v51 }
  0xc5   :  { %438 = vst.msk [vmem:[#allocation2 + $0x10] sm:$0xff] %vm435_vm1, %v1190_v14  ;;  %v453_v52 = vld [vmem:[#allocation2 + $0x8] sm:$0xff] }
  0xc6   :  { %835 = vmatmul.mubr.f32.vlgmr.msra.gmra.mxu0 %v453_v52 }
  0xc7   :  { %v131_v53 = vpop.trf.xlu1 }
  0xc8   :  { %342 = vst.msk [vmem:[#allocation2 + $0x18] sm:$0xff] %vm338_vm0, %v131_v53 }
  0xc9   :  { %439 = vst.msk [vmem:[#allocation2 + $0x18] sm:$0xff] %vm435_vm1, %v1195_v16 }
  0xcc   :  { %v454_v54 = vld [vmem:[#allocation2 + $0x10] sm:$0xff] }
  0xcd   :  { %837 = vmatprep.mubr.f32.mxu0 %v454_v54 }
  0xd0   :  { %v455_v55 = vld [vmem:[#allocation2 + $0x18] sm:$0xff] }
  0xd1   :  { %838 = vmatmul.mubr.f32.gmra.mxu0 %v455_v55 }
  0xd8   :  { %v226_v56 = vpop.trf.xlu0 }
  0xd9   :  { %347 = vst.msk [vmem:[#allocation2 + $0x40] sm:$0xff] %vm338_vm0, %v226_v56 }
  0xda   :  { %444 = vst.msk [vmem:[#allocation2 + $0x40] sm:$0xff] %vm435_vm1, %v1203_v19 }
  0xdc   :  { %v227_v57 = vpop.trf.xlu0 }
  0xdd   :  { %348 = vst.msk [vmem:[#allocation2 + $0x48] sm:$0xff] %vm338_vm0, %v227_v57 }
  0xde   :  { %445 = vst.msk [vmem:[#allocation2 + $0x48] sm:$0xff] %vm435_vm1, %v1216_v24 }
  0xe1   :  { %v460_v58 = vld [vmem:[#allocation2 + $0x40] sm:$0xff] }
  0xe2   :  { %846 = vmatprep.mubr.f32.mxu1 %v460_v58 }
  0xe3   :  { %v162_v59 = vpop.trf.xlu1 }
  0xe4   :  { %343 = vst.msk [vmem:[#allocation2 + $0x20] sm:$0xff] %vm338_vm0, %v162_v59 }
  0xe5   :  { %440 = vst.msk [vmem:[#allocation2 + $0x20] sm:$0xff] %vm435_vm1, %v1205_v20  ;;  %v461_v60 = vld [vmem:[#allocation2 + $0x48] sm:$0xff] }
  0xe6   :  { %847 = vmatmul.mubr.f32.vlgmr.msra.gmra.mxu1 %v461_v60 }
  0xe7   :  { %v163_v61 = vpop.trf.xlu1 }
  0xe8   :  { %344 = vst.msk [vmem:[#allocation2 + $0x28] sm:$0xff] %vm338_vm0, %v163_v61 }
  0xe9   :  { %441 = vst.msk [vmem:[#allocation2 + $0x28] sm:$0xff] %vm435_vm1, %v1221_v26 }
  0xec   :  { %v456_v62 = vld [vmem:[#allocation2 + $0x20] sm:$0xff] }
  0xed   :  { %840 = vmatprep.mubr.f32.mxu0 %v456_v62 }
  0xf0   :  { %v457_v63 = vld [vmem:[#allocation2 + $0x28] sm:$0xff] }
  0xf1   :  { %841 = vmatmul.mubr.f32.gmra.mxu0 %v457_v63 }
  0xf8   :  { %v258_v0 = vpop.trf.xlu0 }
  0xf9   :  { %349 = vst.msk [vmem:[#allocation2 + $0x50] sm:$0xff] %vm338_vm0, %v258_v0 }
  0xfa   :  { %446 = vst.msk [vmem:[#allocation2 + $0x50] sm:$0xff] %vm435_vm1, %v1229_v29 }
  0xfc   :  { %v259_v1 = vpop.trf.xlu0 }
  0xfd   :  { %350 = vst.msk [vmem:[#allocation2 + $0x58] sm:$0xff] %vm338_vm0, %v259_v1 }
  0xfe   :  { %447 = vst.msk [vmem:[#allocation2 + $0x58] sm:$0xff] %vm435_vm1, %v1242_v34 }
 0x101   :  { %v462_v2 = vld [vmem:[#allocation2 + $0x50] sm:$0xff] }
 0x102   :  { %849 = vmatprep.mubr.f32.mxu1 %v462_v2 }
 0x103   :  { %v194_v3 = vpop.trf.xlu1 }
 0x104   :  { %345 = vst.msk [vmem:[#allocation2 + $0x30] sm:$0xff] %vm338_vm0, %v194_v3 }
 0x105   :  { %442 = vst.msk [vmem:[#allocation2 + $0x30] sm:$0xff] %vm435_vm1, %v1231_v30  ;;  %v463_v4 = vld [vmem:[#allocation2 + $0x58] sm:$0xff] }
 0x106   :  { %850 = vmatmul.mubr.f32.gmra.mxu1 %v463_v4 }
 0x107   :  { %v195_v5 = vpop.trf.xlu1 }
 0x108   :  { %346 = vst.msk [vmem:[#allocation2 + $0x38] sm:$0xff] %vm338_vm0, %v195_v5 }
 0x109   :  { %443 = vst.msk [vmem:[#allocation2 + $0x38] sm:$0xff] %vm435_vm1, %v1247_v36 }
 0x10c   :  { %v458_v6 = vld [vmem:[#allocation2 + $0x30] sm:$0xff] }
 0x10d   :  { %843 = vmatprep.mubr.f32.mxu0 %v458_v6  ;;  %v769_v6 = vld [vmem:[%s1335_s3] ss:$0 sm:$0xff]  ;;  %s916_s3 = smov [#allocation3]  }
 0x10e   :  { %s761_s16 = sshll.u32 %s916_s3, 4  ;;  %s762_s16 = int_to_ptr.vmem [resolvable:$true] %s761_s16 }
 0x10f   :  { %s893_s17 = scalar_lea.vmem %s762_s16, 128  ;;  %p898_p1 = scmp.lt.s32.totalorder %s762_s16, %s762_s16 }
 0x110   :  { %v459_v7 = vld [vmem:[#allocation2 + $0x38] sm:$0xff]  ;;  %p894_p0 = scmp.ne.s32.totalorder %s762_s16, %s893_s17  ;;  %p899_p2 = scmp.lt.s32.totalorder %s893_s17, %s893_s17 }
 0x111   :  { %844 = vmatmul.mubr.f32.gmra.mxu0 %v459_v7 }
 0x112   :  { %p900_p3 = por %p899_p2, %p898_p1 }
 0x114   :  { %p901_p4 = pnand %p900_p3, %p894_p0 }
 0x118   :  { %v290_v8 = vpop.trf.xlu0 }
 0x119   :  { %351 = vst.msk [vmem:[#allocation2 + $0x60] sm:$0xff] %vm338_vm0, %v290_v8 }
 0x11a   :  { %448 = vst.msk [vmem:[#allocation2 + $0x60] sm:$0xff] %vm435_vm1, %v1255_v39 }
 0x11c   :  { %v291_v9 = vpop.trf.xlu0 }
 0x11d   :  { %352 = vst.msk [vmem:[#allocation2 + $0x68] sm:$0xff] %vm338_vm0, %v291_v9 }
 0x11e   :  { %449 = vst.msk [vmem:[#allocation2 + $0x68] sm:$0xff] %vm435_vm1, %v1268_v45 }
 0x121   :  { %v464_v10 = vld [vmem:[#allocation2 + $0x60] sm:$0xff] }
 0x122   :  { %852 = vmatprep.mubr.f32.mxu1 %v464_v10 }
 0x123   :  { %v322_v11 = vpop.trf.xlu1 }
 0x124   :  { %353 = vst.msk [vmem:[#allocation2 + $0x70] sm:$0xff] %vm338_vm0, %v322_v11 }
 0x125   :  { %450 = vst.msk [vmem:[#allocation2 + $0x70] sm:$0xff] %vm435_vm1, %v1257_v40  ;;  %v465_v12 = vld [vmem:[#allocation2 + $0x68] sm:$0xff] }
 0x126   :  { %853 = vmatmul.mubr.f32.gmra.mxu1 %v465_v12 }
 0x127   :  { %v323_v13 = vpop.trf.xlu1 }
 0x128   :  { %354 = vst.msk [vmem:[#allocation2 + $0x78] sm:$0xff] %vm338_vm0, %v323_v13  ;;  %vm751_vm0 = vcmask 1047559  }
 0x129   :  { %451 = vst.msk [vmem:[#allocation2 + $0x78] sm:$0xff] %vm435_vm1, %v1279_v48 }
 0x12c   :  { %v466_v14 = vld [vmem:[#allocation2 + $0x70] sm:$0xff] }
 0x12d   :  { %855 = vmatprep.mubr.f32.mxu1 %v466_v14 }
 0x130   :  { %v467_v15 = vld [vmem:[#allocation2 + $0x78] sm:$0xff] }
 0x131   :  { %856 = vmatmul.mubr.f32.gmra.mxu1 %v467_v15 }
 0x186   :  { %v836_v16 = vpop.f32.mrf.mxu0 }
 0x188   :  { %v550_v17 = vpop.f32.mrf.mxu0 }
 0x189   :  { %v629_v31 = vmax.f32 %v550_v17, %v836_v16 }
 0x18b   :  { %v630_v37 = vrot.slane %v629_v31, 4 }
 0x18d   :  { %v631_v43 = vmax.f32 %v629_v31, %v630_v37 }
 0x18f   :  { %v632_v49 = vrot.slane %v631_v43, 2 }
 0x191   :  { %v839_v18 = vpop.f32.mrf.mxu0  ;;  %v633_v57 = vmax.f32 %v631_v43, %v632_v49 }
 0x193   :  { %v560_v19 = vpop.f32.mrf.mxu0  ;;  %v634_v1 = vrot.slane %v633_v57, 1 }
 0x194   :  { %v636_v25 = vmax.f32 %v560_v19, %v839_v18 }
 0x195   :  { %v635_v10 = vmax.f32 %v633_v57, %v634_v1 }
 0x196   :  { %v637_v30 = vrot.slane %v636_v25, 4 }
 0x198   :  { %v638_v36 = vmax.f32 %v636_v25, %v637_v30 }
 0x19a   :  { %v639_v42 = vrot.slane %v638_v36, 2 }
 0x19c   :  { %v640_v48 = vmax.f32 %v638_v36, %v639_v42 }
 0x19e   :  { %v641_v55 = vrot.slane %v640_v48, 1 }
 0x1a0   :  { %v642_v0 = vmax.f32 %v640_v48, %v641_v55 }
 0x1a2   :  { %v693_v9 = vadd.f32 %v769_v6, %v642_v0 }
 0x1a4   :  { %v709_v19 = vmul.f32 0.01, %v693_v9  ;;  %vm701_vm2 = vcmp.gt.f32.partialorder %v693_v9, 0.0 }
 0x1a6   :  { %v848_v22 = vpop.f32.mrf.mxu1 }
 0x1a8   :  { %v590_v26 = vpop.f32.mrf.mxu1 }
 0x1a9   :  { %v657_v34 = vmax.f32 %v590_v26, %v848_v22 }
 0x1ab   :  { %v658_v41 = vrot.slane %v657_v34, 4 }
 0x1ad   :  { %v659_v47 = vmax.f32 %v657_v34, %v658_v41 }
 0x1af   :  { %v660_v54 = vrot.slane %v659_v47, 2 }
 0x1b1   :  { %v842_v20 = vpop.f32.mrf.mxu0  ;;  %v661_v62 = vmax.f32 %v659_v47, %v660_v54 }
 0x1b3   :  { %v570_v21 = vpop.f32.mrf.mxu0  ;;  %v662_v7 = vrot.slane %v661_v62, 1 }
 0x1b4   :  { %v643_v27 = vmax.f32 %v570_v21, %v842_v20  ;;  %v692_v21 = vadd.f32 %v769_v6, %v635_v10 }
 0x1b5   :  { %v663_v16 = vmax.f32 %v661_v62, %v662_v7 }
 0x1b6   :  { %v644_v32 = vrot.slane %v643_v27, 4  ;;  %vm700_vm5 = vcmp.gt.f32.partialorder %v692_v21, 0.0 }
 0x1b8   :  { %v645_v38 = vmax.f32 %v643_v27, %v644_v32  ;;  %v696_v27 = vadd.f32 %v769_v6, %v663_v16  ;;  %v708_v32 = vmul.f32 0.01, %v692_v21 }
 0x1ba   :  { %v646_v44 = vrot.slane %v645_v38, 2  ;;  %v712_v37 = vmul.f32 0.01, %v696_v27  ;;  %vm704_vm6 = vcmp.gt.f32.partialorder %v696_v27, 0.0  ;;  %v716_v42 = vsel %vm700_vm5, %v692_v21, %v708_v32 }
 0x1bc   :  { %v647_v50 = vmax.f32 %v645_v38, %v646_v44 }
 0x1be   :  { %v648_v58 = vrot.slane %v647_v50, 1 }
 0x1c0   :  { %v649_v2 = vmax.f32 %v647_v50, %v648_v58 }
 0x1c2   :  { %v694_v11 = vadd.f32 %v769_v6, %v649_v2 }
 0x1c4   :  { %v710_v22 = vmul.f32 0.01, %v694_v11  ;;  %vm702_vm3 = vcmp.gt.f32.partialorder %v694_v11, 0.0 }
 0x1c6   :  { %v851_v29 = vpop.f32.mrf.mxu1  ;;  %v718_v30 = vsel %vm702_vm3, %v694_v11, %v710_v22 }
 0x1c7   :  { %v735_v38 = vrot.slane %v718_v30, 6 }
 0x1c8   :  { %v600_v35 = vpop.f32.mrf.mxu1 }
 0x1c9   :  { %v664_v39 = vmax.f32 %v600_v35, %v851_v29 }
 0x1cb   :  { %v665_v45 = vrot.slane %v664_v39, 4 }
 0x1cd   :  { %v666_v51 = vmax.f32 %v664_v39, %v665_v45  ;;  %v720_v45 = vsel %vm704_vm6, %v696_v27, %v712_v37 }
 0x1cf   :  { %v667_v60 = vrot.slane %v666_v51, 2 }
 0x1d1   :  { %v845_v23 = vpop.f32.mrf.mxu0  ;;  %v668_v4 = vmax.f32 %v666_v51, %v667_v60 }
 0x1d3   :  { %v580_v24 = vpop.f32.mrf.mxu0  ;;  %v669_v14 = vrot.slane %v668_v4, 1 }
 0x1d4   :  { %v650_v28 = vmax.f32 %v580_v24, %v845_v23 }
 0x1d5   :  { %v670_v24 = vmax.f32 %v668_v4, %v669_v14 }
 0x1d6   :  { %v651_v33 = vrot.slane %v650_v28, 4 }
 0x1d8   :  { %v652_v40 = vmax.f32 %v650_v28, %v651_v33  ;;  %v717_v28 = vsel %vm701_vm2, %v693_v9, %v709_v19  ;;  %v697_v33 = vadd.f32 %v769_v6, %v670_v24 }
 0x1d9   :  { %v732_v36 = vrot.slane %v717_v28, 7 }
 0x1da   :  { %v653_v46 = vrot.slane %v652_v40, 2  ;;  %v713_v43 = vmul.f32 0.01, %v697_v33  ;;  %vm705_vm11 = vcmp.gt.f32.partialorder %v697_v33, 0.0 }
 0x1dc   :  { %v654_v52 = vmax.f32 %v652_v40, %v653_v46  ;;  %v734_v46 = vsel %vm733_vm7, %v732_v36, %v716_v42 }
 0x1dd   :  { %v737_v48 = vsel %vm736_vm8, %v735_v38, %v734_v46 }
 0x1de   :  { %v655_v61 = vrot.slane %v654_v52, 1 }
 0x1e0   :  { %v656_v5 = vmax.f32 %v654_v52, %v655_v61  ;;  %v721_v52 = vsel %vm705_vm11, %v697_v33, %v713_v43 }
 0x1e1   :  { %v744_v57 = vrot.slane %v721_v52, 3 }
 0x1e2   :  { %v695_v15 = vadd.f32 %v769_v6, %v656_v5 }
 0x1e4   :  { %v711_v25 = vmul.f32 0.01, %v695_v15  ;;  %vm703_vm4 = vcmp.gt.f32.partialorder %v695_v15, 0.0 }
 0x1e6   :  { %v854_v53 = vpop.f32.mrf.mxu1  ;;  %v719_v34 = vsel %vm703_vm4, %v695_v15, %v711_v25 }
 0x1e7   :  { %v738_v40 = vrot.slane %v719_v34, 5 }
 0x1e8   :  { %v610_v56 = vpop.f32.mrf.mxu1 }
 0x1e9   :  { %v671_v59 = vmax.f32 %v610_v56, %v854_v53  ;;  %v740_v50 = vsel %vm739_vm9, %v738_v40, %v737_v48  ;;  %v741_v53 = vrot.slane %v720_v45, 4 }
 0x1eb   :  { %v672_v63 = vrot.slane %v671_v59, 4  ;;  %v743_v55 = vsel %vm742_vm12, %v741_v53, %v740_v50 }
 0x1ed   :  { %v673_v3 = vmax.f32 %v671_v59, %v672_v63  ;;  %v746_v59 = vsel %vm745_vm13, %v744_v57, %v743_v55 }
 0x1ef   :  { %v674_v8 = vrot.slane %v673_v3, 2 }
 0x1f1   :  { %v675_v12 = vmax.f32 %v673_v3, %v674_v8  ;;  %v857_v13 = vpop.f32.mrf.mxu1 }
 0x1f3   :  { %v676_v17 = vrot.slane %v675_v12, 1  ;;  %v620_v18 = vpop.f32.mrf.mxu1 }
 0x1f4   :  { %v678_v20 = vmax.f32 %v620_v18, %v857_v13 }
 0x1f5   :  { %v677_v23 = vmax.f32 %v675_v12, %v676_v17 }
 0x1f6   :  { %v679_v26 = vrot.slane %v678_v20, 4 }
 0x1f7   :  { %v698_v31 = vadd.f32 %v769_v6, %v677_v23 }
 0x1f8   :  { %v680_v29 = vmax.f32 %v678_v20, %v679_v26 }
 0x1f9   :  { %v714_v41 = vmul.f32 0.01, %v698_v31  ;;  %vm706_vm10 = vcmp.gt.f32.partialorder %v698_v31, 0.0 }
 0x1fa   :  { %v681_v35 = vrot.slane %v680_v29, 2 }
 0x1fb   :  { %v722_v49 = vsel %vm706_vm10, %v698_v31, %v714_v41 }
 0x1fc   :  { %v682_v39 = vmax.f32 %v680_v29, %v681_v35  ;;  %v747_v56 = vrot.slane %v722_v49, 2 }
 0x1fe   :  { %v683_v44 = vrot.slane %v682_v39, 1  ;;  %v749_v61 = vsel %vm748_vm15, %v747_v56, %v746_v59 }
 0x200   :  { %v684_v47 = vmax.f32 %v682_v39, %v683_v44 }
 0x202   :  { %v699_v51 = vadd.f32 %v769_v6, %v684_v47 }
 0x204   :  { %vm707_vm14 = vcmp.gt.f32.partialorder %v699_v51, 0.0  ;;  %v715_v54 = vmul.f32 0.01, %v699_v51 }
 0x206   :  { %v723_v58 = vsel %vm707_vm14, %v699_v51, %v715_v54 }
 0x207   :  { %v750_v60 = vrot.slane %v723_v58, 1 }
 0x209   :  { %v752_v62 = vsel %vm751_vm0, %v750_v60, %v749_v61 }
 0x20a   :  { %754 = vst [vmem:[#allocation3] sm:$0xff] %v752_v62 }
 0x20b   :  { %904 = shalt.err (!%p901_p4)
}
 0x20c   :  { %764 = dma.vmem_to_hbm [thread:$0]  %s762_s16, 128, %s1336_s4, [#allocation4]  }
 0x20d   :  { %913 = dma.done.wait [#allocation4], 128  }
 0x20e   :  { %914 = vsyncadd [#allocation4], 4294967168 }
 0x20f   :  { %768 = vsyncpa [#allocation4], 1 }

</bundles_post_ra>
